<compile_context>
chip_gen: v7x
topology: tpu7x:2x2x1
jax: 0.10.0
libtpu: 0.0.40
codegen_flags: <defaults>
</compile_context>

<pallas_src>
import functools

import jax
import jax.numpy as jnp
from jax.experimental import pallas as pl
from jax.experimental.pallas import tpu as pltpu

# Module hyperparameters (from the PyTorch module)
hardtanh_max = 1.0
hardtanh_min = -1.0
in_channels = 32
out_channels = 64
kernel_size = 4
stride = 2
padding = 1
maxpool_kernel_size = 2
maxpool_stride = 2

_ROW_CAP = 8192  # max rows (M) per grid step; fits 32 MiB scoped VMEM everywhere


def _parity_taps():
    """For each of the 4 conv-transpose output parities (a, b), the list of
    (kh, kw, oh0, ow0) taps, where (oh0, ow0) is the static start of the
    contiguous H x W slice of the zero-padded input that the tap reads."""
    taps = []
    for a in range(2):
        for b in range(2):
            plist = []
            for kh in range(kernel_size):
                if (kh % 2) != ((a + 1) % 2):
                    continue  # this tap only touches the other row parity
                oh0 = (a + 1 - kh) // 2 + 1  # start in padded coordinates
                for kw in range(kernel_size):
                    if (kw % 2) != ((b + 1) % 2):
                        continue
                    ow0 = (b + 1 - kw) // 2 + 1
                    plist.append((kh, kw, oh0, ow0))
            taps.append(plist)
    return taps


def _fused_kernel(lhs_ref, w_ref, b_ref, o_ref, acc_ref, *,
                  n_par, kpar, bblk, tsp, inv_hw):
    """lhs_ref: (1, Mblk, n_par*kpar) bf16 im2col slab (Mblk = bblk*tsp rows);
    w_ref:   (n_par, kpar, Cout) bf16 tap-merged weights;
    b_ref:   (1, Cout) f32 bias;
    o_ref:   (1, bblk, Cout) f32 output;
    acc_ref: (bblk, Cout) f32 per-batch spatial-sum accumulator (scratch)."""
    j = pl.program_id(1)  # spatial-tile axis ("arbitrary")

    pooled = None
    for p in range(n_par):
        # Static, lane-aligned slice of the slab; one (M,128)x(128,64) MXU push.
        lhs_p = lhs_ref[0, :, p * kpar:(p + 1) * kpar]
        y = jnp.dot(lhs_p, w_ref[p], preferred_element_type=jnp.float32)
        pooled = y if pooled is None else jnp.maximum(pooled, y)   # 2x2 maxpool

    # Bias is constant across the 4 parities of a pool cell, so it commutes
    # with the max; then hardtanh.
    pooled = pooled + b_ref[...]
    pooled = jnp.clip(pooled, hardtanh_min, hardtanh_max)

    # Per-batch-element partial spatial sum for this tile (sublane reduce).
    if bblk == 1:
        part = jnp.sum(pooled, axis=0, keepdims=True)                  # (1, Cout)
    else:
        part = jnp.sum(pooled.reshape(bblk, tsp, pooled.shape[-1]), axis=1)

    @pl.when(j == 0)
    def _():
        acc_ref[...] = jnp.zeros_like(acc_ref)

    acc_ref[...] += part

    @pl.when(j == pl.num_programs(1) - 1)
    def _():
        o_ref[0] = jnp.tanh(acc_ref[...] * inv_hw).astype(o_ref.dtype)


def model_forward(x, weight, bias):
    """x: (B, Cin, H, W) NCHW; weight: (Cin, Cout, K, K); bias: (Cout,).
    Returns (B, Cout, 1, 1), matching the PyTorch module."""
    B, Cin, H, W = x.shape
    Cin_w, Cout, K, K2 = weight.shape
    assert Cin == Cin_w and K == K2
    # The parity/tap decomposition hard-codes these hyperparameters.
    assert (K, stride, padding, maxpool_kernel_size, maxpool_stride) == (4, 2, 1, 2, 2), \
        "kernel specializes stride=2, padding=1, K=4, maxpool 2/2"

    taps = _parity_taps()
    n_par = len(taps)          # 4 parities (== maxpool cell)
    tpp = len(taps[0])         # 4 taps per parity
    kpar = tpp * Cin           # 128 = matmul K per parity
    HW = H * W

    # ---- wrapper-side layout / im2col. bf16 BEFORE pad/slice/concat so the
    # dominant HBM intermediate (the 16x-duplicated slab) is built in bf16.
    x_nhwc = jnp.transpose(x, (0, 2, 3, 1)).astype(jnp.bfloat16)
    x_pad = jnp.pad(x_nhwc, ((0, 0), (1, 1), (1, 1), (0, 0)))
    slabs = []
    for plist in taps:
        for (kh, kw, oh0, ow0) in plist:
            slabs.append(x_pad[:, oh0:oh0 + H, ow0:ow0 + W, :])
    lhs = jnp.concatenate(slabs, axis=-1)                    # (B, H, W, 16*Cin) bf16
    lhs = lhs.reshape(B * HW, n_par * kpar)

    # Tap-merged per-parity weight: (n_par, kpar, Cout), bf16 for the MXU.
    w_par = []
    for plist in taps:
        w_par.append(jnp.concatenate(
            [weight[:, :, kh, kw] for (kh, kw, _, _) in plist], axis=0))
    w_packed = jnp.stack(w_par, axis=0).astype(jnp.bfloat16)

    b_mat = bias.reshape(1, Cout).astype(jnp.float32)

    # ---- tiling: fold batch into the matmul M dimension; tile spatially only
    # when a single image exceeds the row cap (keeps VMEM bounded for big H*W).
    if HW <= _ROW_CAP:
        nsp, tsp = 1, HW
        max_bblk = max(1, min(B, _ROW_CAP // HW))
        if B > 1:
            # Keep >= 2 grid steps so both TensorCores get work on v7x
            # (a single extra step costs ~0.35 us on v5e/v6e — negligible).
            max_bblk = max(1, min(max_bblk, B // 2))
        bblk = 1
        for cand in range(max_bblk, 0, -1):
            if B % cand == 0:
                bblk = cand
                break
        # The per-batch reduce reshape needs whole (8-sublane) groups per batch.
        if bblk > 1 and (HW % 8) != 0:
            bblk = 1
        nblk = B // bblk
    else:
        bblk, nblk = 1, B
        tsp = None
        for cand in range(min(_ROW_CAP, HW), 0, -1):
            if HW % cand == 0 and cand % 8 == 0:
                tsp = cand
                break
        if tsp is None:
            tsp = HW  # fall back to a single (large) spatial tile
        nsp = HW // tsp

    Mblk = bblk * tsp
    lhs = lhs.reshape(nblk, nsp * Mblk, n_par * kpar)

    kernel = functools.partial(_fused_kernel, n_par=n_par, kpar=kpar,
                               bblk=bblk, tsp=tsp, inv_hw=1.0 / float(HW))

    out = pl.pallas_call(
        kernel,
        out_shape=jax.ShapeDtypeStruct((nblk, bblk, Cout), jnp.float32),
        grid_spec=pltpu.PrefetchScalarGridSpec(
            num_scalar_prefetch=0,
            grid=(nblk, nsp),
            in_specs=[
                pl.BlockSpec((1, Mblk, n_par * kpar), lambda i, j: (i, j, 0)),
                pl.BlockSpec((n_par, kpar, Cout), lambda i, j: (0, 0, 0)),
                pl.BlockSpec((1, Cout), lambda i, j: (0, 0)),
            ],
            out_specs=pl.BlockSpec((1, bblk, Cout), lambda i, j: (i, 0, 0)),
            scratch_shapes=[pltpu.VMEM((bblk, Cout), jnp.float32)],
        ),
        compiler_params=pltpu.CompilerParams(
            dimension_semantics=("parallel", "arbitrary"),
            vmem_limit_bytes=32 * 1024 * 1024),
    )(lhs, w_packed, b_mat)

    return out.reshape(B, Cout, 1, 1)


def reference_forward(x, weight, bias):
    """Pure-JAX reference mirroring the PyTorch module_fn."""
    B, Cin, H, W = x.shape
    _, Cout, K, _ = weight.shape
    # conv_transpose2d == conv with zero-upsampled input and flipped/transposed kernel
    w_conv = jnp.flip(weight, axis=(2, 3)).transpose(1, 0, 2, 3)  # (Cout,Cin,K,K)
    y = jax.lax.conv_general_dilated(
        x, w_conv,
        window_strides=(1, 1),
        padding=[(K - 1 - padding, K - 1 - padding)] * 2,
        lhs_dilation=(stride, stride),
        dimension_numbers=("NCHW", "OIHW", "NCHW"),
        precision=jax.lax.Precision.HIGHEST)
    y = y + bias.reshape(1, Cout, 1, 1)
    y = jax.lax.reduce_window(
        y, -jnp.inf, jax.lax.max,
        (1, 1, maxpool_kernel_size, maxpool_kernel_size),
        (1, 1, maxpool_stride, maxpool_stride), "VALID")
    y = jnp.clip(y, hardtanh_min, hardtanh_max)
    y = jnp.mean(y, axis=(2, 3), keepdims=True)
    return jnp.tanh(y)


if __name__ == "__main__":
    key = jax.random.PRNGKey(0)
    k_x, k_w, k_b = jax.random.split(key, 3)

    B, H, W = 2, 8, 8
    x = jax.random.normal(k_x, (B, in_channels, H, W), dtype=jnp.float32)
    # Deterministic synthetic parameters (ConvTranspose2d weight: (Cin, Cout, K, K)).
    weight = 0.05 * jax.random.normal(
        k_w, (in_channels, out_channels, kernel_size, kernel_size),
        dtype=jnp.float32)
    bias = 0.05 * jax.random.normal(k_b, (out_channels,), dtype=jnp.float32)

    out = model_forward(x, weight, bias)
    out = jax.block_until_ready(out)

    ref = reference_forward(x, weight, bias)
    assert out.shape == (B, out_channels, 1, 1), out.shape
    # bf16 matmul operands vs. f32 HIGHEST reference -> tolerance, not bit-exact.
    if not jnp.allclose(out, ref, atol=3e-3, rtol=3e-3):
        max_err = float(jnp.max(jnp.abs(out - ref)))
        raise AssertionError(f"mismatch vs reference, max abs err = {max_err}")

    print("KERNEL_OK")
</pallas_src>

<mosaic_0001>
module attributes {stable_mosaic.version = 11 : i64} {
  func.func @_fused_kernel(%arg0: i32, %arg1: i32, %arg2: memref<1x64x512xbf16, #tpu.memory_space<vmem>>, %arg3: memref<4x128x64xbf16, #tpu.memory_space<vmem>>, %arg4: memref<1x64xf32, #tpu.memory_space<vmem>>, %arg5: memref<1x1x64xf32, #tpu.memory_space<vmem>>, %arg6: memref<1x64xf32, #tpu.memory_space<vmem>>) attributes {dimension_semantics = [#tpu.dimension_semantics<parallel>, #tpu.dimension_semantics<arbitrary>], iteration_bounds = array<i64: 2, 1>, scalar_prefetch = 0 : i64, scratch_operands = 1 : i64, tpu.core_type = #tpu.core_type<tc>, window_params = [{transform_indices = @transform_0, window_bounds = array<i64: 1, 64, 512>}, {pipeline_mode = #tpu.pipeline_mode<synchronous>, transform_indices = @transform_1, window_bounds = array<i64: 4, 128, 64>}, {pipeline_mode = #tpu.pipeline_mode<synchronous>, transform_indices = @transform_2, window_bounds = array<i64: 1, 64>}, {transform_indices = @transform_3, window_bounds = array<i64: 1, 1, 64>}]} {
    %c0 = arith.constant 0 : index
    %c0_0 = arith.constant 0 : index
    %c0_1 = arith.constant 0 : index
    %0 = vector.load %arg2[%c0, %c0_0, %c0_1] : memref<1x64x512xbf16, #tpu.memory_space<vmem>>, vector<1x64x128xbf16>
    %1 = vector.shape_cast %0 : vector<1x64x128xbf16> to vector<64x128xbf16>
    %c0_2 = arith.constant 0 : index
    %c0_3 = arith.constant 0 : index
    %c0_4 = arith.constant 0 : index
    %2 = vector.load %arg3[%c0_2, %c0_3, %c0_4] : memref<4x128x64xbf16, #tpu.memory_space<vmem>>, vector<1x128x64xbf16>
    %3 = vector.shape_cast %2 : vector<1x128x64xbf16> to vector<128x64xbf16>
    %cst = arith.constant dense<0.000000e+00> : vector<64x64xf32>
    %4 = tpu.matmul %1, %3, %cst {dimension_numbers = #tpu.dot_dimension_numbers<[1], [0], [0], [1], [0, 0, 1, 1], [], []>} : vector<64x128xbf16>, vector<128x64xbf16>, vector<64x64xf32> -> vector<64x64xf32>
    %c0_5 = arith.constant 0 : index
    %c0_6 = arith.constant 0 : index
    %c128 = arith.constant 128 : index
    %5 = vector.load %arg2[%c0_5, %c0_6, %c128] : memref<1x64x512xbf16, #tpu.memory_space<vmem>>, vector<1x64x128xbf16>
    %6 = vector.shape_cast %5 : vector<1x64x128xbf16> to vector<64x128xbf16>
    %c1 = arith.constant 1 : index
    %c0_7 = arith.constant 0 : index
    %c0_8 = arith.constant 0 : index
    %7 = vector.load %arg3[%c1, %c0_7, %c0_8] : memref<4x128x64xbf16, #tpu.memory_space<vmem>>, vector<1x128x64xbf16>
    %8 = vector.shape_cast %7 : vector<1x128x64xbf16> to vector<128x64xbf16>
    %cst_9 = arith.constant dense<0.000000e+00> : vector<64x64xf32>
    %9 = tpu.matmul %6, %8, %cst_9 {dimension_numbers = #tpu.dot_dimension_numbers<[1], [0], [0], [1], [0, 0, 1, 1], [], []>} : vector<64x128xbf16>, vector<128x64xbf16>, vector<64x64xf32> -> vector<64x64xf32>
    %10 = arith.maximumf %4, %9 : vector<64x64xf32>
    %c0_10 = arith.constant 0 : index
    %c0_11 = arith.constant 0 : index
    %c256 = arith.constant 256 : index
    %11 = vector.load %arg2[%c0_10, %c0_11, %c256] : memref<1x64x512xbf16, #tpu.memory_space<vmem>>, vector<1x64x128xbf16>
    %12 = vector.shape_cast %11 : vector<1x64x128xbf16> to vector<64x128xbf16>
    %c2 = arith.constant 2 : index
    %c0_12 = arith.constant 0 : index
    %c0_13 = arith.constant 0 : index
    %13 = vector.load %arg3[%c2, %c0_12, %c0_13] : memref<4x128x64xbf16, #tpu.memory_space<vmem>>, vector<1x128x64xbf16>
    %14 = vector.shape_cast %13 : vector<1x128x64xbf16> to vector<128x64xbf16>
    %cst_14 = arith.constant dense<0.000000e+00> : vector<64x64xf32>
    %15 = tpu.matmul %12, %14, %cst_14 {dimension_numbers = #tpu.dot_dimension_numbers<[1], [0], [0], [1], [0, 0, 1, 1], [], []>} : vector<64x128xbf16>, vector<128x64xbf16>, vector<64x64xf32> -> vector<64x64xf32>
    %16 = arith.maximumf %10, %15 : vector<64x64xf32>
    %c0_15 = arith.constant 0 : index
    %c0_16 = arith.constant 0 : index
    %c384 = arith.constant 384 : index
    %17 = vector.load %arg2[%c0_15, %c0_16, %c384] : memref<1x64x512xbf16, #tpu.memory_space<vmem>>, vector<1x64x128xbf16>
    %18 = vector.shape_cast %17 : vector<1x64x128xbf16> to vector<64x128xbf16>
    %c3 = arith.constant 3 : index
    %c0_17 = arith.constant 0 : index
    %c0_18 = arith.constant 0 : index
    %19 = vector.load %arg3[%c3, %c0_17, %c0_18] : memref<4x128x64xbf16, #tpu.memory_space<vmem>>, vector<1x128x64xbf16>
    %20 = vector.shape_cast %19 : vector<1x128x64xbf16> to vector<128x64xbf16>
    %cst_19 = arith.constant dense<0.000000e+00> : vector<64x64xf32>
    %21 = tpu.matmul %18, %20, %cst_19 {dimension_numbers = #tpu.dot_dimension_numbers<[1], [0], [0], [1], [0, 0, 1, 1], [], []>} : vector<64x128xbf16>, vector<128x64xbf16>, vector<64x64xf32> -> vector<64x64xf32>
    %22 = arith.maximumf %16, %21 : vector<64x64xf32>
    %c0_20 = arith.constant 0 : index
    %c0_21 = arith.constant 0 : index
    %23 = vector.load %arg4[%c0_20, %c0_21] : memref<1x64xf32, #tpu.memory_space<vmem>>, vector<1x64xf32>
    %24 = vector.broadcast %23 : vector<1x64xf32> to vector<64x64xf32>
    %25 = arith.addf %22, %24 : vector<64x64xf32>
    %cst_22 = arith.constant -1.000000e+00 : f32
    %cst_23 = arith.constant 1.000000e+00 : f32
    %26 = vector.broadcast %cst_22 : f32 to vector<64x64xf32>
    %27 = arith.maximumf %26, %25 : vector<64x64xf32>
    %28 = vector.broadcast %cst_23 : f32 to vector<64x64xf32>
    %29 = arith.minimumf %28, %27 : vector<64x64xf32>
    %cst_24 = arith.constant dense<0.000000e+00> : vector<64xf32>
    %30 = vector.multi_reduction <add>, %29, %cst_24 [0] : vector<64x64xf32> to vector<64xf32>
    %31 = vector.shape_cast %30 : vector<64xf32> to vector<1x64xf32>
    %c0_i32 = arith.constant 0 : i32
    %32 = arith.cmpi eq, %arg1, %c0_i32 : i32
    %33 = arith.extui %32 : i1 to i32
    %c0_i32_25 = arith.constant 0 : i32
    %34 = arith.cmpi ne, %33, %c0_i32_25 : i32
    scf.if %34 {
      %cst_32 = arith.constant 0.000000e+00 : f32
      %41 = vector.broadcast %cst_32 : f32 to vector<1x64xf32>
      %c0_33 = arith.constant 0 : index
      %c0_34 = arith.constant 0 : index
      %42 = vector.load %arg6[%c0_33, %c0_34] : memref<1x64xf32, #tpu.memory_space<vmem>>, vector<1x64xf32>
      tpu.vector_store %arg6[%c0_33, %c0_34], %41 {strides = array<i32>} : memref<1x64xf32, #tpu.memory_space<vmem>>, vector<1x64xf32>,
    } else {
    }
    %c0_26 = arith.constant 0 : index
    %c0_27 = arith.constant 0 : index
    %35 = vector.load %arg6[%c0_26, %c0_27] : memref<1x64xf32, #tpu.memory_space<vmem>>, vector<1x64xf32>
    %36 = arith.addf %35, %31 : vector<1x64xf32>
    %c0_28 = arith.constant 0 : index
    %c0_29 = arith.constant 0 : index
    %37 = vector.load %arg6[%c0_28, %c0_29] : memref<1x64xf32, #tpu.memory_space<vmem>>, vector<1x64xf32>
    tpu.vector_store %arg6[%c0_28, %c0_29], %36 {strides = array<i32>} : memref<1x64xf32, #tpu.memory_space<vmem>>, vector<1x64xf32>,
    %c0_i32_30 = arith.constant 0 : i32
    %38 = arith.cmpi eq, %arg1, %c0_i32_30 : i32
    %39 = arith.extui %38 : i1 to i32
    %c0_i32_31 = arith.constant 0 : i32
    %40 = arith.cmpi ne, %39, %c0_i32_31 : i32
    scf.if %40 {
      %c0_32 = arith.constant 0 : index
      %c0_33 = arith.constant 0 : index
      %41 = vector.load %arg6[%c0_32, %c0_33] : memref<1x64xf32, #tpu.memory_space<vmem>>, vector<1x64xf32>
      %cst_34 = arith.constant 1.562500e-02 : f32
      %42 = vector.broadcast %cst_34 : f32 to vector<1x64xf32>
      %43 = arith.mulf %41, %42 : vector<1x64xf32>
      %44 = math.tanh %43 : vector<1x64xf32>
      %c0_35 = arith.constant 0 : index
      %c0_36 = arith.constant 0 : index
      %c0_37 = arith.constant 0 : index
      %45 = vector.load %arg5[%c0_35, %c0_36, %c0_37] : memref<1x1x64xf32, #tpu.memory_space<vmem>>, vector<1x1x64xf32>
      %46 = vector.shape_cast %45 : vector<1x1x64xf32> to vector<1x64xf32>
      %47 = vector.shape_cast %44 : vector<1x64xf32> to vector<1x1x64xf32>
      tpu.vector_store %arg5[%c0_35, %c0_36, %c0_37], %47 {strides = array<i32>} : memref<1x1x64xf32, #tpu.memory_space<vmem>>, vector<1x1x64xf32>,
    } else {
    }
    return
  }
  func.func @transform_0(%arg0: i32, %arg1: i32) -> (i32, i32, i32) {
    %c0_i32 = arith.constant 0 : i32
    %c0_i32_0 = arith.constant 0 : i32
    return %arg0, %arg1, %c0_i32 : i32, i32, i32
  }
  func.func @transform_1(%arg0: i32, %arg1: i32) -> (i32, i32, i32) {
    %c0_i32 = arith.constant 0 : i32
    %c0_i32_0 = arith.constant 0 : i32
    %c0_i32_1 = arith.constant 0 : i32
    %c0_i32_2 = arith.constant 0 : i32
    return %c0_i32, %c0_i32_0, %c0_i32_1 : i32, i32, i32
  }
  func.func @transform_2(%arg0: i32, %arg1: i32) -> (i32, i32) {
    %c0_i32 = arith.constant 0 : i32
    %c0_i32_0 = arith.constant 0 : i32
    %c0_i32_1 = arith.constant 0 : i32
    return %c0_i32, %c0_i32_0 : i32, i32
  }
  func.func @transform_3(%arg0: i32, %arg1: i32) -> (i32, i32, i32) {
    %c0_i32 = arith.constant 0 : i32
    %c0_i32_0 = arith.constant 0 : i32
    %c0_i32_1 = arith.constant 0 : i32
    return %arg0, %c0_i32, %c0_i32_0 : i32, i32, i32
  }
}

</mosaic_0001>

<bundles_post_ra>
// kernel: tpu_custom_call.1
= control target key start
LH: loop header
LB: loop body
LE: loop exit
PB: predicated region body
PF: predicated region fallthrough
CT: control target
= control target key end

     0   :  { %8 = vsyncpa [#allocation4], 0  ;;  %s1734_s0 = inlined_call_operand.vmem [shape: bf16[2,64,512], index: 0, kind: input, shape index: {}]   ;;  %s1735_s1 = inlined_call_operand.vmem [shape: bf16[4,128,64], index: 1, kind: input, shape index: {}]   ;;  %s1736_s2 = inlined_call_operand.vmem [shape: f32[1,64], index: 2, kind: input, shape index: {}]   ;;  %s1737_s3 = inlined_call_operand.hbm [shape: f32[2,1,64], index: 3, kind: output, shape index: {}]  }
   0x1   :  { %10 = vsyncpa [#allocation4 + $0x1], 0  ;;  %s1494_s12 = smov 0   ;;  %s1496_s13 = smov 0  }
   0x2   :  { %s1498_s14 = smov 0   ;;  %s1500_s15 = smov 0  }
   0x3   :  { %s1502_s16 = smov 0   ;;  %s1504_s17 = smov 0  }
   0x4 LB: > { %s1026_s18 = sadd.s32 4294967295, %s1470_s17   ;;  %s1027_s19 = sadd.s32 4294967294, %s1470_s17   ;;  %s1470_s17 = sphi %s1504_s17, %s16_s17   ;;  %s1466_s16 = sphi %s1502_s16, %s1744_s16   ;;  %s1462_s15 = sphi %s1500_s15, %s1743_s15   ;;  %s1458_s14 = sphi %s1498_s14, %s1742_s14   ;;  %s1454_s13 = sphi %s1496_s13, %s1741_s13   ;;  %s1450_s12 = sphi %s1494_s12, %s1740_s12  }
   0x5   : > { %s28_s20 = sadd.s32 1, %s1466_s16  ;;  %s105_s21 = sadd.s32 1, %s1458_s14 }
   0x6   : > { %p30_p0 = scmp.ge.s32.totalorder %s28_s20, 2  ;;  %p115_p1 = scmp.ne.s32.totalorder %s1458_s14, %s1454_s13 }
   0x7   : > { %p116_p2 = scmp.eq.s32.totalorder %s1026_s18, 1  ;;  %p121_p3 = scmp.ne.s32.totalorder %s1454_s13, %s1450_s12 }
   0x8   : > { %s1746_s20 = smov (%p30_p0, %s28_s20), 0  ;;  %p122_p5 = scmp.eq.s32.totalorder %s1027_s19, 1 }
   0x9   : > { %p1534_p4 = por %p116_p2, %p115_p1  ;;  %s102_s23 = ssub.s32 %s1466_s16, %s1746_s20 }
   0xa   : > { %p1030_p6 = scmp.ge.s32.totalorder %s1470_s17, 1  ;;  %p103_p7 = scmp.eq.s32.totalorder %s102_s23, 0 }
   0xb   : > { %p1541_p8 = por %p122_p5, %p121_p3  ;;  %p160_p9 = scmp.lt.s32.totalorder %s1470_s17, 3 }
   0xc   : > { %s1547_s25 = scalar_select %p103_p7, %s1458_s14, %s105_s21  }
   0xd   : > { %p161_p10 = pnand %p1030_p6, %p160_p9 }
   0xe   : > { %v1342_v0 = vld [vmem:[%s1735_s1] sm:$0xff] (!%p161_p10)   ;;  %v1344_v2 = vld [vmem:[%s1735_s1 + $0x8] sm:$0xff] (!%p161_p10)   ;;  %p189_p11 = scmp.lt.s32.totalorder (!%p161_p10), %s1462_s15, 1  ;;  %v1346_v4 = vld [vmem:[%s1735_s1 + $0x10] sm:$0xff] (!%p161_p10)   ;;  %vm928_vm0 = vcmask (!%p161_p10), 516096   ;;  %v1472_v48 = vmov (!%p161_p10), 0.0  }
   0xf   : > { %164 = sbr.rel (%p161_p10) target bundleno = 366 (0x16e), region = 32  ;;  %v1343_v1 = vld [vmem:[%s1735_s1 + $0x40] sm:$0xff] (!%p161_p10)   ;;  %1190 = vmatprep.subr.bf16.mxu0 (!%p161_p10), %v1342_v0  ;;  %v1345_v3 = vld [vmem:[%s1735_s1 + $0x48] sm:$0xff] (!%p161_p10)   ;;  %v1347_v5 = vld [vmem:[%s1735_s1 + $0x50] sm:$0xff] (!%p161_p10)   ;;  %929 = vst.msk [vmem:[#allocation2] sm:$0x1] (!%p161_p10), %vm928_vm0, %v1472_v48 }
  0x10   : > { %1214 = vmatprep.subr.bf16.mxu1 (!%p161_p10), %v1343_v1  ;;  %1191 = vmatpush3.bf16.msra.mxu0 (!%p161_p10), %v1342_v0  ;;  %v1348_v6 = vld [vmem:[%s1735_s1 + $0x18] sm:$0xff] (!%p161_p10)   ;;  %v1350_v8 = vld [vmem:[%s1735_s1 + $0x20] sm:$0xff] (!%p161_p10)   ;;  %v1352_v10 = vld [vmem:[%s1735_s1 + $0x28] sm:$0xff] (!%p161_p10)   ;;  %vm902_vm1 = vcmask (!%p161_p10), 523264   ;;  %s186_s30 = sand.u32 (!%p161_p10), 1, %s1454_s13   ;;  %s1138_s4 = sshll.u32 (!%p161_p10), %s1462_s15, 4 }
  0x11   : > { %1215 = vmatpush3.bf16.msra.mxu1 (!%p161_p10), %v1343_v1  ;;  %1192 = vmatprep.subr.bf16.mxu0 (!%p161_p10), %v1344_v2  ;;  %v1349_v7 = vld [vmem:[%s1735_s1 + $0x58] sm:$0xff] (!%p161_p10)   ;;  %v1351_v9 = vld [vmem:[%s1735_s1 + $0x60] sm:$0xff] (!%p161_p10)   ;;  %v1353_v11 = vld [vmem:[%s1735_s1 + $0x68] sm:$0xff] (!%p161_p10)   ;;  %s187_s5 = scalar_lea.vmem (!%p161_p10), [#allocation3], %s186_s30  ;;  %s1686_s10 = scalar_lea.hbm (!%p161_p10), %s1737_s3, %s1138_s4 }
  0x12   : > { %1216 = vmatprep.subr.bf16.mxu1 (!%p161_p10), %v1345_v3  ;;  %v1354_v14 = vld [vmem:[%s1735_s1 + $0x30] sm:$0xff] (!%p161_p10)   ;;  %v1356_v16 = vld [vmem:[%s1735_s1 + $0x38] sm:$0xff] (!%p161_p10)   ;;  %v1362_v19 = vld [vmem:[%s1735_s1 + $0x80] sm:$0xff] (!%p161_p10)   ;;  %s954_s7 = sshll.u32 (!%p161_p10), %s187_s5, 4  ;;  %s1688_s7 = int_to_ptr.vmem [resolvable:$true] %s954_s7 }
  0x13   : > { %v1355_v15 = vld [vmem:[%s1735_s1 + $0x70] sm:$0xff] (!%p161_p10)   ;;  %v1357_v17 = vld [vmem:[%s1735_s1 + $0x78] sm:$0xff] (!%p161_p10)   ;;  %v1363_v20 = vld [vmem:[%s1735_s1 + $0xc0] sm:$0xff] (!%p161_p10)   ;;  %s1392_s18 = scalar_lea.vmem (!%p161_p10), %s1688_s7, 16 }
  0x14   : > { %1193 = vmatpush3.bf16.msra.mxu0 (!%p161_p10), %v1344_v2  ;;  %v1364_v22 = vld [vmem:[%s1735_s1 + $0x88] sm:$0xff] (!%p161_p10)   ;;  %v1366_v26 = vld [vmem:[%s1735_s1 + $0x90] sm:$0xff] (!%p161_p10)   ;;  %v1368_v28 = vld [vmem:[%s1735_s1 + $0x98] sm:$0xff] (!%p161_p10)   ;;  %p1393_p12 = scmp.ne.s32.totalorder (!%p161_p10), %s1688_s7, %s1392_s18 }
  0x15   : > { %1217 = vmatpush3.bf16.msra.mxu1 (!%p161_p10), %v1345_v3  ;;  %1194 = vmatprep.subr.bf16.mxu0 (!%p161_p10), %v1346_v4  ;;  %v1365_v23 = vld [vmem:[%s1735_s1 + $0xc8] sm:$0xff] (!%p161_p10)   ;;  %v1367_v27 = vld [vmem:[%s1735_s1 + $0xd0] sm:$0xff] (!%p161_p10)   ;;  %v1369_v31 = vld [vmem:[%s1735_s1 + $0xd8] sm:$0xff] (!%p161_p10)  }
  0x16   : > { %s190_s11 = scalar_select %p189_p11, %s1462_s15, 1  ;;  %1218 = vmatprep.subr.bf16.mxu1 %v1347_v5  ;;  %v1370_v34 = vld [vmem:[%s1735_s1 + $0xa0] sm:$0xff]   ;;  %v1374_v36 = vld [vmem:[%s1735_s1 + $0xa8] sm:$0xff]   ;;  %v1378_v38 = vld [vmem:[%s1735_s1 + $0xb0] sm:$0xff]  }
  0x17   : > { %v1371_v35 = vld [vmem:[%s1735_s1 + $0xe0] sm:$0xff]   ;;  %v1375_v37 = vld [vmem:[%s1735_s1 + $0xe8] sm:$0xff]   ;;  %v1379_v39 = vld [vmem:[%s1735_s1 + $0xf0] sm:$0xff]   ;;  %p1394_p13 = pnand %p1393_p12, %p1534_p4  ;;  %s1473_s15 = smov [#allocation3]  }
  0x18   : > { %s1141_s26 = sshll.u32 %s190_s11, 7  ;;  %1195 = vmatpush3.bf16.msra.mxu0 %v1346_v4  ;;  %v1380_v40 = vld [vmem:[%s1735_s1 + $0xb8] sm:$0xff]   ;;  %s942_s11 = scalar_lea.sflag [#allocation4], %s186_s30 }
  0x19   : > { %1219 = vmatpush3.bf16.msra.mxu1 %v1347_v5  ;;  %1196 = vmatprep.subr.bf16.mxu0 %v1348_v6  ;;  %s1584_s6 = scalar_lea.vmem %s1734_s0, %s1141_s26  ;;  %v1381_v41 = vld [vmem:[%s1735_s1 + $0xf8] sm:$0xff]   ;;  %p1395_p0 = pneg %p1394_p13 }
  0x1a   : > { %1220 = vmatprep.subr.bf16.mxu1 %v1349_v7  ;;  %v1358_v12 = vld [vmem:[%s1584_s6] ss:$16 sps:$4 sm:$0xff]   ;;  %v1359_v13 = vld [vmem:[%s1584_s6 + $0x4] ss:$16 sps:$4 sm:$0xff]   ;;  %v1382_v32 = vld [vmem:[%s1584_s6 + $0x8] ss:$16 sps:$4 sm:$0xff]  }
  0x1b   : > { %1206 = vmatprep.mubr.bf16.mxu0 %v1358_v12  ;;  %1230 = vmatprep.mubr.bf16.mxu1 %v1359_v13  ;;  %v1360_v18 = vld [vmem:[%s1584_s6 + $0x20] ss:$16 sps:$4 sm:$0xff]   ;;  %v1361_v21 = vld [vmem:[%s1584_s6 + $0x24] ss:$16 sps:$4 sm:$0xff]   ;;  %v1383_v33 = vld [vmem:[%s1584_s6 + $0xc] ss:$16 sps:$4 sm:$0xff]  }
  0x1c   : > { %1197 = vmatpush3.bf16.msra.mxu0 %v1348_v6  ;;  %v1372_v24 = vld [vmem:[%s1584_s6 + $0x40] ss:$16 sps:$4 sm:$0xff]   ;;  %v1373_v25 = vld [vmem:[%s1584_s6 + $0x44] ss:$16 sps:$4 sm:$0xff]   ;;  %v1384_v42 = vld [vmem:[%s1584_s6 + $0x28] ss:$16 sps:$4 sm:$0xff]  }
  0x1d   : > { %1221 = vmatpush3.bf16.msra.mxu1 %v1349_v7  ;;  %1198 = vmatprep.subr.bf16.mxu0 %v1350_v8  ;;  %v1376_v29 = vld [vmem:[%s1584_s6 + $0x60] ss:$16 sps:$4 sm:$0xff]   ;;  %v1377_v30 = vld [vmem:[%s1584_s6 + $0x64] ss:$16 sps:$4 sm:$0xff]   ;;  %v1385_v43 = vld [vmem:[%s1584_s6 + $0x2c] ss:$16 sps:$4 sm:$0xff]  }
  0x1e   : > { %1222 = vmatprep.subr.bf16.mxu1 %v1351_v9  ;;  %v1386_v44 = vld [vmem:[%s1584_s6 + $0x48] ss:$16 sps:$4 sm:$0xff]   ;;  %v1387_v45 = vld [vmem:[%s1584_s6 + $0x4c] ss:$16 sps:$4 sm:$0xff]   ;;  %s1396_s19 = sshll.u32 %s1473_s15, 4  ;;  %s1397_s19 = int_to_ptr.vmem [resolvable:$false] %s1396_s19 }
  0x1f   : > { %v1388_v46 = vld [vmem:[%s1584_s6 + $0x68] ss:$16 sps:$4 sm:$0xff]   ;;  %v1389_v47 = vld [vmem:[%s1584_s6 + $0x6c] ss:$16 sps:$4 sm:$0xff]   ;;  %s1398_s21 = scalar_lea.vmem %s1397_s19, 32  ;;  %p1399_p1 = scmp.lt.s32.totalorder %s1688_s7, %s1397_s19 }
  0x20   : > { %1199 = vmatpush3.bf16.msra.mxu0 %v1350_v8  ;;  %p1400_p2 = scmp.lt.s32.totalorder %s1398_s21, %s1392_s18 }
  0x21   : > { %1223 = vmatpush3.bf16.msra.mxu1 %v1351_v9  ;;  %1200 = vmatprep.subr.bf16.mxu0 %v1352_v10 }
  0x22   : > { %1224 = vmatprep.subr.bf16.mxu1 %v1353_v11  ;;  %p1401_p3 = por %p1400_p2, %p1399_p1 }
  0x24   : > { %1201 = vmatpush3.bf16.msra.mxu0 %v1352_v10  ;;  %p1402_p5 = pnand %p1401_p3, %p1395_p0 }
  0x25   : > { %1225 = vmatpush3.bf16.msra.mxu1 %v1353_v11  ;;  %1202 = vmatprep.subr.bf16.mxu0 %v1354_v14 }
  0x26   : > { %1226 = vmatprep.subr.bf16.mxu1 %v1355_v15 }
  0x28   : > { %1203 = vmatpush3.bf16.msra.mxu0 %v1354_v14 }
  0x29   : > { %1227 = vmatpush3.bf16.msra.mxu1 %v1355_v15  ;;  %1204 = vmatprep.subr.bf16.mxu0 %v1356_v16 }
  0x2a   : > { %1228 = vmatprep.subr.bf16.mxu1 %v1357_v17 }
  0x2c   : > { %1205 = vmatpush3.bf16.msra.mxu0 %v1356_v16 }
  0x2d   : > { %1229 = vmatpush3.bf16.msra.mxu1 %v1357_v17  ;;  %1238 = vmatprep.subr.bf16.mxu0 %v1362_v19  ;;  %v1129_v17 = vld [vmem:[%s1736_s2] ss:$0 sm:$0xff] }
  0x2e   : > { %1262 = vmatprep.subr.bf16.mxu1 %v1363_v20 }
  0x2f   : > { %1207 = vmatmul.mubr.bf16.vlgmr.msra.gmra.mrb[0].mxu0 %v1360_v18 }
  0x30   : > { %1231 = vmatmul.mubr.bf16.vlgmr.msra.gmra.mrb[0].mxu1 %v1361_v21  ;;  %1239 = vmatpush3.bf16.msra.mxu0 %v1362_v19 }
  0x31   : > { %1263 = vmatpush3.bf16.msra.mxu1 %v1363_v20  ;;  %1240 = vmatprep.subr.bf16.mxu0 %v1364_v22 }
  0x32   : > { %1264 = vmatprep.subr.bf16.mxu1 %v1365_v23  ;;  %1210 = vmatprep.mubr.bf16.mxu0 %v1372_v24 }
  0x33   : > { %1234 = vmatprep.mubr.bf16.mxu1 %v1373_v25 }
  0x34   : > { %1241 = vmatpush3.bf16.msra.mxu0 %v1364_v22 }
  0x35   : > { %1265 = vmatpush3.bf16.msra.mxu1 %v1365_v23  ;;  %1242 = vmatprep.subr.bf16.mxu0 %v1366_v26 }
  0x36   : > { %1266 = vmatprep.subr.bf16.mxu1 %v1367_v27 }
  0x37   : > { %1211 = vmatmul.mubr.bf16.gmra.mrb[4].mxu0 %v1376_v29 }
  0x38   : > { %1243 = vmatpush3.bf16.msra.mxu0 %v1366_v26  ;;  %1235 = vmatmul.mubr.bf16.gmra.mrb[4].mxu1 %v1377_v30 }
  0x39   : > { %1267 = vmatpush3.bf16.msra.mxu1 %v1367_v27  ;;  %1244 = vmatprep.subr.bf16.mxu0 %v1368_v28 }
  0x3a   : > { %1268 = vmatprep.subr.bf16.mxu1 %v1369_v31  ;;  %1254 = vmatprep.mubr.bf16.mxu0 %v1382_v32 }
  0x3b   : > { %1278 = vmatprep.mubr.bf16.mxu1 %v1383_v33 }
  0x3c   : > { %1245 = vmatpush3.bf16.msra.mxu0 %v1368_v28 }
  0x3d   : > { %1269 = vmatpush3.bf16.msra.mxu1 %v1369_v31  ;;  %1246 = vmatprep.subr.bf16.mxu0 %v1370_v34 }
  0x3e   : > { %1270 = vmatprep.subr.bf16.mxu1 %v1371_v35 }
  0x40   : > { %1247 = vmatpush3.bf16.msra.mxu0 %v1370_v34 }
  0x41   : > { %1271 = vmatpush3.bf16.msra.mxu1 %v1371_v35  ;;  %1248 = vmatprep.subr.bf16.mxu0 %v1374_v36 }
  0x42   : > { %1272 = vmatprep.subr.bf16.mxu1 %v1375_v37 }
  0x44   : > { %1249 = vmatpush3.bf16.msra.mxu0 %v1374_v36 }
  0x45   : > { %1273 = vmatpush3.bf16.msra.mxu1 %v1375_v37  ;;  %1250 = vmatprep.subr.bf16.mxu0 %v1378_v38 }
  0x46   : > { %1274 = vmatprep.subr.bf16.mxu1 %v1379_v39 }
  0x48   : > { %1251 = vmatpush3.bf16.msra.mxu0 %v1378_v38 }
  0x49   : > { %1275 = vmatpush3.bf16.msra.mxu1 %v1379_v39  ;;  %1252 = vmatprep.subr.bf16.mxu0 %v1380_v40 }
  0x4a   : > { %1276 = vmatprep.subr.bf16.mxu1 %v1381_v41 }
  0x4c   : > { %1253 = vmatpush3.bf16.msra.mxu0 %v1380_v40 }
  0x4d   : > { %1277 = vmatpush3.bf16.msra.mxu1 %v1381_v41 }
  0x4f   : > { %1255 = vmatmul.mubr.bf16.vlgmr.msra.gmra.mrb[8].mxu0 %v1384_v42 }
  0x50   : > { %1279 = vmatmul.mubr.bf16.vlgmr.msra.gmra.mrb[8].mxu1 %v1385_v43  ;;  %1258 = vmatprep.mubr.bf16.mxu0 %v1386_v44 }
  0x51   : > { %1282 = vmatprep.mubr.bf16.mxu1 %v1387_v45 }
  0x57   : > { %1259 = vmatmul.mubr.bf16.gmra.mrb[12].mxu0 %v1388_v46 }
  0x58   : > { %1283 = vmatmul.mubr.bf16.gmra.mrb[12].mxu1 %v1389_v47 }
 0x102   : > { %v1208_v49 = vpop.f32.mrb[0].mxu0 }
 0x103   : > { %v1232_v50 = vpop.f32.mrb[0].mxu1  ;;  %v330_v51 = vpop.f32.mrb[1].mxu0 }
 0x104   : > { %v525_v52 = vmax.f32 %v1208_v49, %v1232_v50  ;;  %v492_v53 = vpop.f32.mrb[1].mxu1  ;;  %v1209_v54 = vpop.f32.mrb[2].mxu0 }
 0x105   : > { %v523_v55 = vmax.f32 %v330_v51, %v492_v53  ;;  %v1233_v56 = vpop.f32.mrb[2].mxu1  ;;  %v333_v57 = vpop.f32.mrb[3].mxu0 }
 0x106   : > { %v526_v58 = vmax.f32 %v1209_v54, %v1233_v56  ;;  %v495_v59 = vpop.f32.mrb[3].mxu1 }
 0x107   : > { %v524_v60 = vmax.f32 %v333_v57, %v495_v59 }
 0x10a   : > { %v1212_v61 = vpop.f32.mrb[4].mxu0 }
 0x10b   : > { %v1236_v62 = vpop.f32.mrb[4].mxu1  ;;  %v346_v63 = vpop.f32.mrb[5].mxu0 }
 0x10c   : > { %v529_v0 = vmax.f32 %v1212_v61, %v1236_v62  ;;  %v508_v1 = vpop.f32.mrb[5].mxu1  ;;  %v1213_v2 = vpop.f32.mrb[6].mxu0 }
 0x10d   : > { %v527_v3 = vmax.f32 %v346_v63, %v508_v1  ;;  %v1237_v4 = vpop.f32.mrb[6].mxu1  ;;  %v349_v5 = vpop.f32.mrb[7].mxu0 }
 0x10e   : > { %v530_v6 = vmax.f32 %v1213_v2, %v1237_v4  ;;  %v511_v7 = vpop.f32.mrb[7].mxu1 }
 0x10f   : > { %v528_v8 = vmax.f32 %v349_v5, %v511_v7 }
 0x122   : > { %v1256_v9 = vpop.f32.mrb[8].mxu0 }
 0x123   : > { %v695_v10 = vmax.f32 %v525_v52, %v1256_v9  ;;  %v1280_v11 = vpop.f32.mrb[8].mxu1  ;;  %v662_v12 = vpop.f32.mrb[9].mxu0 }
 0x124   : > { %v693_v13 = vmax.f32 %v523_v55, %v662_v12  ;;  %v832_v14 = vpop.f32.mrb[9].mxu1  ;;  %v1257_v15 = vpop.f32.mrb[10].mxu0 }
 0x125   : > { %v865_v16 = vmax.f32 %v695_v10, %v1280_v11  ;;  %v696_v18 = vmax.f32 %v526_v58, %v1257_v15  ;;  %v1281_v19 = vpop.f32.mrb[10].mxu1  ;;  %v665_v20 = vpop.f32.mrb[11].mxu0 }
 0x126   : > { %v863_v21 = vmax.f32 %v693_v13, %v832_v14  ;;  %v694_v22 = vmax.f32 %v524_v60, %v665_v20  ;;  %v835_v23 = vpop.f32.mrb[11].mxu1  ;;  %v930_v14 = vld [vmem:[#allocation2] sm:$0x1] }
 0x127   : > { %v866_v24 = vmax.f32 %v696_v18, %v1281_v19  ;;  %v880_v25 = vadd.f32 %v1129_v17, %v865_v16 }
 0x128   : > { %v878_v26 = vadd.f32 %v1129_v17, %v863_v21  ;;  %v864_v27 = vmax.f32 %v694_v22, %v835_v23 }
 0x129   : > { %v881_v28 = vadd.f32 %v1129_v17, %v866_v24  ;;  %v1132_v35 = vclamps-f32 %v880_v25, 1.0 }
 0x12a   : > { %v1130_v29 = vclamps-f32 %v878_v26, 1.0  ;;  %v879_v30 = vadd.f32 %v1129_v17, %v864_v27  ;;  %v1260_v31 = vpop.f32.mrb[12].mxu0 }
 0x12b   : > { %v699_v32 = vmax.f32 %v529_v0, %v1260_v31  ;;  %v1284_v33 = vpop.f32.mrb[12].mxu1  ;;  %v678_v34 = vpop.f32.mrb[13].mxu0  ;;  %v1133_v40 = vclamps-f32 %v881_v28, 1.0  ;;  %v906_v52 = vsel %vm902_vm1, %v1132_v35, 0.0 }
 0x12c   : > { %v1131_v36 = vclamps-f32 %v879_v30, 1.0  ;;  %v697_v37 = vmax.f32 %v527_v3, %v678_v34  ;;  %v848_v38 = vpop.f32.mrb[13].mxu1  ;;  %v1261_v39 = vpop.f32.mrb[14].mxu0  ;;  %v903_v45 = vsel %vm902_vm1, %v1130_v29, 0.0 }
 0x12d   : > { %v869_v41 = vmax.f32 %v699_v32, %v1284_v33  ;;  %v700_v42 = vmax.f32 %v530_v6, %v1261_v39  ;;  %v1285_v43 = vpop.f32.mrb[14].mxu1  ;;  %v681_v44 = vpop.f32.mrb[15].mxu0  ;;  %v908_v57 = vsel %vm902_vm1, %v1133_v40, 0.0 }
 0x12e   : > { %v904_v46 = vsel %vm902_vm1, %v1131_v36, 0.0  ;;  %v867_v47 = vmax.f32 %v697_v37, %v848_v38  ;;  %v698_v48 = vmax.f32 %v528_v8, %v681_v44  ;;  %v851_v49 = vpop.f32.mrb[15].mxu1 }
 0x12f   : > { %v905_v50 = vadd.f32 %v904_v46, %v903_v45  ;;  %v870_v51 = vmax.f32 %v700_v42, %v1285_v43  ;;  %v884_v53 = vadd.f32 %v1129_v17, %v869_v41 }
 0x130   : > { %v882_v54 = vadd.f32 %v1129_v17, %v867_v47  ;;  %v868_v55 = vmax.f32 %v698_v48, %v851_v49 }
 0x131   : > { %v907_v56 = vadd.f32 %v906_v52, %v905_v50  ;;  %v885_v59 = vadd.f32 %v1129_v17, %v870_v51  ;;  %v1136_v62 = vclamps-f32 %v884_v53, 1.0 }
 0x132   : > { %v1134_v58 = vclamps-f32 %v882_v54, 1.0  ;;  %v883_v60 = vadd.f32 %v1129_v17, %v868_v55 }
 0x133   : > { %v909_v61 = vadd.f32 %v908_v57, %v907_v56  ;;  %v1137_v2 = vclamps-f32 %v885_v59, 1.0  ;;  %v914_v5 = vsel %vm902_vm1, %v1136_v62, 0.0 }
 0x134   : > { %v910_v63 = vsel %vm902_vm1, %v1134_v58, 0.0  ;;  %v1135_v0 = vclamps-f32 %v883_v60, 1.0 }
 0x135   : > { %v911_v1 = vadd.f32 %v910_v63, %v909_v61  ;;  %v916_v7 = vsel %vm902_vm1, %v1137_v2, 0.0 }
 0x136   : > { %v912_v3 = vsel %vm902_vm1, %v1135_v0, 0.0 }
 0x137   : > { %v913_v4 = vadd.f32 %v912_v3, %v911_v1 }
 0x139   : > { %v915_v6 = vadd.f32 %v914_v5, %v913_v4 }
 0x13b   : > { %v917_v8 = vadd.f32 %v916_v7, %v915_v6 }
 0x13d   : > { %v918_v9 = vrot.slane %v917_v8, 4 }
 0x13f   : > { %v919_v10 = vadd.f32 %v918_v9, %v917_v8 }
 0x141   : > { %v920_v11 = vrot.slane %v919_v10, 2 }
 0x143   : > { %v921_v12 = vadd.f32 %v920_v11, %v919_v10 }
 0x145   : > { %v922_v13 = vrot.slane %v921_v12, 1 }
 0x147   : > { %v923_v15 = vadd.f32 %v922_v13, %v921_v12 }
 0x149   : > { %v931_v16 = vadd.f32 %v930_v14, %v923_v15 }
 0x14b   : > { %933 = vst.msk [vmem:[#allocation2] sm:$0x1] %vm928_vm0, %v931_v16 }
 0x152   : > { %v937_v17 = vld [vmem:[#allocation2] sm:$0x1] }
 0x153   : > { %v938_v18 = vmul.f32 0.015625, %v937_v17 }
 0x155   : > { %1390 = vtanh.f32 %v938_v18 }
 0x15f   : > { %v1391_v19 = vpop.eup %1390 }
 0x160   : > { %940 = vst.msk [vmem:[%s187_s5] sm:$0x1] %vm928_vm0, %v1391_v19 }
 0x161   : > { %1405 = shalt.err (!%p1402_p5)
}
 0x162   : > { %s1406_s23 = scalar_lea.hbm %s1686_s10, 16  ;;  %s1410_s28 = scalar_lea.hbm %s1737_s3, 32 }
 0x163   : > { %p1407_p6 = scmp.ne.s32.totalorder %s1686_s10, %s1406_s23  ;;  %p1411_p10 = scmp.lt.u32.totalorder %s1686_s10, %s1737_s3 }
 0x164   : > { %p1412_p11 = scmp.lt.u32.totalorder %s1410_s28, %s1406_s23  ;;  %p1414_p13 = scmp.lt.u32.totalorder %s1406_s23, %s1686_s10 }
 0x165   : > { %p1408_p7 = pnand %p1407_p6, %p1534_p4 }
 0x166   : > { %p1413_p12 = por %p1412_p11, %p1411_p10 }
 0x167   : > { %p1409_p9 = pneg %p1408_p7 }
 0x168   : > { %p1415_p0 = por %p1414_p13, %p1413_p12 }
 0x16a   : > { %p1416_p1 = pnand %p1415_p0, %p1409_p9 }
 0x16c   : > { %1419 = shalt.err (!%p1416_p1)
}
 0x16d   : > { %1286 = dma.vmem_to_hbm [thread:$0]  (%p1534_p4), %s1688_s7, 16, %s1686_s10, %s942_s11  }
 0x16e PF: > { %p1292_p2 = scmp.ge.s32.totalorder %s1470_s17, 2  ;;  %s966_s30 = sand.u32 1, %s1450_s12  }
 0x16f   : > { %s967_s4 = scalar_lea.sflag [#allocation4], %s966_s30 }
 0x170   : > { %p1289_p3 = pnand %p1292_p2, %p1541_p8 }
 0x172   : > { %1445 = dma.done.wait (!%p1289_p3), %s967_s4, 16  }
 0x173   : > { %1447 = vsyncadd (!%p1289_p3), %s967_s4, 4294967280  ;;  %s16_s17 = sadd.s32 1, %s1470_s17   ;;  %s1740_s12 = smov %s1454_s13 }
 0x174   : > { %p13_p5 = scmp.ge.s32.totalorder %s16_s17, 4   ;;  %s1741_s13 = smov %s1458_s14 }
 0x175   : > { %s1742_s14 = smov %s1547_s25  ;;  %s1743_s15 = smov %s1466_s16 }
 0x176   : > { %s1744_s16 = smov %s1746_s20  ;;  %15 = sbr.rel (!%p13_p5) target bundleno = 4 (0x4), region = 78 }
 0x17d   :  { %971 = vsyncpa [#allocation4], 1 }
 0x17e   :  { %973 = vsyncpa [#allocation4 + $0x1], 1 }

</bundles_post_ra>
